<compile_context>
chip_gen: v5e
topology: v5e:2x2
jax: 0.10.0
libtpu: 0.0.40
codegen_flags: <defaults>
</compile_context>

<pallas_src>
import jax
import jax.numpy as jnp
from jax.experimental import pallas as pl
from jax.experimental.pallas import tpu as pltpu


def _round_up(x: int, m: int) -> int:
    return ((x + m - 1) // m) * m


def _dqn_fwd_kernel(x_ref, w1_ref, b1_ref, w2_ref, b2_ref, out_ref):
    # x_ref  : (TB, D)        compute dtype (bf16 or f32)
    # w1_ref : (D, H)         compute dtype
    # b1_ref : (1, H)         f32
    # w2_ref : (H, A_pad)     compute dtype
    # b2_ref : (1, A_pad)     f32
    # out_ref: (TB, A_pad)    f32
    x = x_ref[...]
    # fc1 (MXU, f32 accumulate) + bias + relu in f32
    h = jnp.dot(x, w1_ref[...], preferred_element_type=jnp.float32)
    h = jnp.maximum(h + b1_ref[...], 0.0)
    # fc2 (cast hidden back to the MXU compute dtype, accumulate in f32)
    h = h.astype(w2_ref.dtype)
    out = jnp.dot(h, w2_ref[...], preferred_element_type=jnp.float32) + b2_ref[...]
    out_ref[...] = out.astype(out_ref.dtype)


def linear_dqn_forward(state, w1, b1, w2, b2, *,
                       compute_dtype=jnp.bfloat16, tb_max=512):
    """Fused forward: relu(state @ w1 + b1) @ w2 + b2.

    state: (B, D) f32      w1: (D, H)  b1: (H,)   w2: (H, A)  b2: (A,)
    Returns (B, A) f32.
    """
    B, D = state.shape
    H = w1.shape[1]
    A = w2.shape[1]

    # Lane-dense output width and batch tiling.
    A_pad = _round_up(max(A, 128), 128)
    tb = min(tb_max, _round_up(B, 8))
    B_pad = _round_up(B, tb)

    # Prepare (padded / casted) operands in the wrapper.
    x = state.astype(compute_dtype)
    if B_pad != B:
        x = jnp.pad(x, ((0, B_pad - B), (0, 0)))
    w1c = w1.astype(compute_dtype)
    w2c = w2.astype(compute_dtype)
    b2p = b2
    if A_pad != A:
        w2c = jnp.pad(w2c, ((0, 0), (0, A_pad - A)))
        b2p = jnp.pad(b2p, (0, A_pad - A))
    b1_2d = b1.reshape(1, H).astype(jnp.float32)
    b2_2d = b2p.reshape(1, A_pad).astype(jnp.float32)

    grid = (B_pad // tb,)

    out = pl.pallas_call(
        _dqn_fwd_kernel,
        out_shape=jax.ShapeDtypeStruct((B_pad, A_pad), jnp.float32),
        grid=grid,
        in_specs=[
            # x tile marches over batch.
            pl.BlockSpec((tb, D), lambda i: (i, 0)),
            # Weights / biases: constant block index -> VMEM-resident across steps.
            pl.BlockSpec((D, H), lambda i: (0, 0)),
            pl.BlockSpec((1, H), lambda i: (0, 0)),
            pl.BlockSpec((H, A_pad), lambda i: (0, 0)),
            pl.BlockSpec((1, A_pad), lambda i: (0, 0)),
        ],
        out_specs=pl.BlockSpec((tb, A_pad), lambda i: (i, 0)),
        compiler_params=pltpu.CompilerParams(
            dimension_semantics=("parallel",),
            # Explicit budget: well under v7x's 64 MiB physical VMEM even with
            # double-buffered x/out tiles at tb_max=512.
            vmem_limit_bytes=32 * 1024 * 1024,
        ),
    )(x, w1c, b1_2d, w2c, b2_2d)

    return out[:B, :A]


def init_params(key, input_dims, n_actions, hidden=128):
    """Deterministic init mimicking PyTorch nn.Linear default (uniform +/- 1/sqrt(fan_in))."""
    k1, k2, k3, k4 = jax.random.split(key, 4)
    bound1 = 1.0 / jnp.sqrt(jnp.float32(input_dims))
    bound2 = 1.0 / jnp.sqrt(jnp.float32(hidden))
    w1 = jax.random.uniform(k1, (input_dims, hidden), jnp.float32, -bound1, bound1)
    b1 = jax.random.uniform(k2, (hidden,), jnp.float32, -bound1, bound1)
    w2 = jax.random.uniform(k3, (hidden, n_actions), jnp.float32, -bound2, bound2)
    b2 = jax.random.uniform(k4, (n_actions,), jnp.float32, -bound2, bound2)
    return w1, b1, w2, b2


if __name__ == "__main__":
    key = jax.random.PRNGKey(0)
    input_dims = 8     # *input_dims of the module
    n_actions = 4
    hidden = 128       # fc1 output size

    kx, kp, kb = jax.random.split(key, 3)
    w1, b1, w2, b2 = init_params(kp, input_dims, n_actions, hidden)

    def ref_fwd(s):
        return jnp.maximum(s @ w1 + b1, 0.0) @ w2 + b2

    # --- small single-step inference shape (B=2), exact f32 path -------------
    state_small = jax.random.normal(kx, (2, input_dims), jnp.float32)
    out_f32 = linear_dqn_forward(state_small, w1, b1, w2, b2,
                                 compute_dtype=jnp.float32)
    out_f32 = jax.block_until_ready(out_f32)
    assert out_f32.shape == (2, n_actions)
    assert jnp.allclose(out_f32, ref_fwd(state_small), atol=1e-5, rtol=1e-5)

    # --- small shape, bf16 MXU path (f32 accumulation) ------------------------
    out_bf16 = linear_dqn_forward(state_small, w1, b1, w2, b2,
                                  compute_dtype=jnp.bfloat16)
    out_bf16 = jax.block_until_ready(out_bf16)
    assert jnp.allclose(out_bf16, ref_fwd(state_small), atol=2e-2, rtol=2e-2)

    # --- replay-buffer-sized batch: exercises the batch-tiled grid ------------
    state_big = jax.random.normal(kb, (1024, input_dims), jnp.float32)
    out_big = linear_dqn_forward(state_big, w1, b1, w2, b2,
                                 compute_dtype=jnp.bfloat16)
    out_big = jax.block_until_ready(out_big)
    assert out_big.shape == (1024, n_actions)
    assert jnp.allclose(out_big, ref_fwd(state_big), atol=2e-2, rtol=2e-2)

    print("KERNEL_OK")
</pallas_src>

<mosaic_0001>
module attributes {stable_mosaic.version = 11 : i64} {
  func.func @_dqn_fwd_kernel(%arg0: i32, %arg1: memref<8x8xf32, #tpu.memory_space<vmem>>, %arg2: memref<8x128xf32, #tpu.memory_space<vmem>>, %arg3: memref<1x128xf32, #tpu.memory_space<vmem>>, %arg4: memref<128x128xf32, #tpu.memory_space<vmem>>, %arg5: memref<1x128xf32, #tpu.memory_space<vmem>>, %arg6: memref<8x128xf32, #tpu.memory_space<vmem>>) attributes {dimension_semantics = [#tpu.dimension_semantics<parallel>], iteration_bounds = array<i64: 1>, scalar_prefetch = 0 : i64, scratch_operands = 0 : i64, tpu.core_type = #tpu.core_type<tc>, window_params = [{transform_indices = @transform_0, window_bounds = array<i64: 8, 8>}, {pipeline_mode = #tpu.pipeline_mode<synchronous>, transform_indices = @transform_1, window_bounds = array<i64: 8, 128>}, {pipeline_mode = #tpu.pipeline_mode<synchronous>, transform_indices = @transform_2, window_bounds = array<i64: 1, 128>}, {pipeline_mode = #tpu.pipeline_mode<synchronous>, transform_indices = @transform_3, window_bounds = array<i64: 128, 128>}, {pipeline_mode = #tpu.pipeline_mode<synchronous>, transform_indices = @transform_4, window_bounds = array<i64: 1, 128>}, {transform_indices = @transform_5, window_bounds = array<i64: 8, 128>}]} {
    %c0 = arith.constant 0 : index
    %c0_0 = arith.constant 0 : index
    %0 = vector.load %arg1[%c0, %c0_0] : memref<8x8xf32, #tpu.memory_space<vmem>>, vector<8x8xf32>
    %c0_1 = arith.constant 0 : index
    %c0_2 = arith.constant 0 : index
    %1 = vector.load %arg2[%c0_1, %c0_2] : memref<8x128xf32, #tpu.memory_space<vmem>>, vector<8x128xf32>
    %cst = arith.constant dense<0.000000e+00> : vector<8x128xf32>
    %2 = tpu.matmul %0, %1, %cst {dimension_numbers = #tpu.dot_dimension_numbers<[1], [0], [0], [1], [0, 0, 1, 1], [], []>} : vector<8x8xf32>, vector<8x128xf32>, vector<8x128xf32> -> vector<8x128xf32>
    %c0_3 = arith.constant 0 : index
    %c0_4 = arith.constant 0 : index
    %3 = vector.load %arg3[%c0_3, %c0_4] : memref<1x128xf32, #tpu.memory_space<vmem>>, vector<1x128xf32>
    %4 = vector.broadcast %3 : vector<1x128xf32> to vector<8x128xf32>
    %5 = arith.addf %2, %4 : vector<8x128xf32>
    %cst_5 = arith.constant 0.000000e+00 : f32
    %6 = vector.broadcast %cst_5 : f32 to vector<8x128xf32>
    %7 = arith.maximumf %5, %6 : vector<8x128xf32>
    %c0_6 = arith.constant 0 : index
    %c0_7 = arith.constant 0 : index
    %8 = vector.load %arg4[%c0_6, %c0_7] : memref<128x128xf32, #tpu.memory_space<vmem>>, vector<128x128xf32>
    %cst_8 = arith.constant dense<0.000000e+00> : vector<8x128xf32>
    %9 = tpu.matmul %7, %8, %cst_8 {dimension_numbers = #tpu.dot_dimension_numbers<[1], [0], [0], [1], [0, 0, 1, 1], [], []>} : vector<8x128xf32>, vector<128x128xf32>, vector<8x128xf32> -> vector<8x128xf32>
    %c0_9 = arith.constant 0 : index
    %c0_10 = arith.constant 0 : index
    %10 = vector.load %arg5[%c0_9, %c0_10] : memref<1x128xf32, #tpu.memory_space<vmem>>, vector<1x128xf32>
    %11 = vector.broadcast %10 : vector<1x128xf32> to vector<8x128xf32>
    %12 = arith.addf %9, %11 : vector<8x128xf32>
    %c0_11 = arith.constant 0 : index
    %c0_12 = arith.constant 0 : index
    %13 = vector.load %arg6[%c0_11, %c0_12] : memref<8x128xf32, #tpu.memory_space<vmem>>, vector<8x128xf32>
    tpu.vector_store %arg6[%c0_11, %c0_12], %12 {strides = array<i32>} : memref<8x128xf32, #tpu.memory_space<vmem>>, vector<8x128xf32>,
    return
  }
  func.func @transform_0(%arg0: i32) -> (i32, i32) {
    %c0_i32 = arith.constant 0 : i32
    %c0_i32_0 = arith.constant 0 : i32
    return %arg0, %c0_i32 : i32, i32
  }
  func.func @transform_1(%arg0: i32) -> (i32, i32) {
    %c0_i32 = arith.constant 0 : i32
    %c0_i32_0 = arith.constant 0 : i32
    %c0_i32_1 = arith.constant 0 : i32
    return %c0_i32, %c0_i32_0 : i32, i32
  }
  func.func @transform_2(%arg0: i32) -> (i32, i32) {
    %c0_i32 = arith.constant 0 : i32
    %c0_i32_0 = arith.constant 0 : i32
    %c0_i32_1 = arith.constant 0 : i32
    return %c0_i32, %c0_i32_0 : i32, i32
  }
  func.func @transform_3(%arg0: i32) -> (i32, i32) {
    %c0_i32 = arith.constant 0 : i32
    %c0_i32_0 = arith.constant 0 : i32
    %c0_i32_1 = arith.constant 0 : i32
    return %c0_i32, %c0_i32_0 : i32, i32
  }
  func.func @transform_4(%arg0: i32) -> (i32, i32) {
    %c0_i32 = arith.constant 0 : i32
    %c0_i32_0 = arith.constant 0 : i32
    %c0_i32_1 = arith.constant 0 : i32
    return %c0_i32, %c0_i32_0 : i32, i32
  }
  func.func @transform_5(%arg0: i32) -> (i32, i32) {
    %c0_i32 = arith.constant 0 : i32
    %c0_i32_0 = arith.constant 0 : i32
    return %arg0, %c0_i32 : i32, i32
  }
}

</mosaic_0001>

<bundles_post_ra>
// kernel: tpu_custom_call.1
= control target key start
LH: loop header
LB: loop body
LE: loop exit
PB: predicated region body
PF: predicated region fallthrough
CT: control target
= control target key end

     0   :  { %10 = vsyncpa [#allocation3], 0  ;;  %s319_s0 = inlined_call_operand.hbm [shape: f32[8,8], index: 0, kind: input, shape index: {}]   ;;  %s320_s1 = inlined_call_operand.hbm [shape: f32[8,128], index: 1, kind: input, shape index: {}]   ;;  %s321_s2 = inlined_call_operand.vmem [shape: f32[1,128], index: 2, kind: input, shape index: {}]   ;;  %s322_s3 = inlined_call_operand.hbm [shape: f32[128,128], index: 3, kind: input, shape index: {}]   ;;  %s323_s4 = inlined_call_operand.vmem [shape: f32[1,128], index: 4, kind: input, shape index: {}]   ;;  %s324_s5 = inlined_call_operand.hbm [shape: f32[8,128], index: 5, kind: output, shape index: {}]  }
   0x1   :  { %11 = vsyncpa [#allocation6], 0  ;;  %s29_s20 = sshll.u32 %s320_s1, 4  ;;  %s30_s20 = int_to_ptr.hbm [resolvable:$true] %s29_s20 }
   0x2   :  { %12 = vsyncpa [#allocation4], 0  ;;  %s265_s21 = smov [#allocation5]   ;;  %s18_s25 = sshll.u32 %s319_s0, 4  ;;  %s19_s25 = int_to_ptr.hbm [resolvable:$true] %s18_s25 }
   0x3   :  { %s31_s22 = sshll.u32 %s265_s21, 4  ;;  %s266_s26 = smov [#allocation2]   ;;  %s32_s22 = int_to_ptr.vmem [resolvable:$true] %s31_s22 }
   0x4   :  { %34 = dma.hbm_to_vmem [thread:$0]  %s30_s20, 128, %s32_s22, [#allocation6]  }
   0x5   :  { %s20_s27 = sshll.u32 %s266_s26, 4  ;;  %s41_s30 = sshll.u32 %s322_s3, 4  ;;  %s21_s27 = int_to_ptr.vmem [resolvable:$true] %s20_s27  ;;  %s42_s30 = int_to_ptr.hbm [resolvable:$true] %s41_s30 }
   0x6   :  { %23 = dma.hbm_to_vmem [thread:$0]  %s19_s25, 128, %s21_s27, [#allocation3]  }
   0x7   :  { %s267_s1 = smov [#allocation7]   ;;  %s268_s7 = smov 128  }
   0x8   :  { %s43_s6 = sshll.u32 %s267_s1, 4  ;;  %s269_s8 = smov 8   ;;  %s44_s6 = int_to_ptr.vmem [resolvable:$true] %s43_s6 }
   0x9   :  { %49 = dma.hbm_to_vmem [thread:$0]  %s42_s30, 2048, %s44_s6, [#allocation6], %s268_s7, %s268_s7, %s269_s8  }
   0xa   :  { %259 = dma.done.wait [#allocation3], 128  }
   0xb   :  { %260 = vsyncadd [#allocation3], 4294967168 }
   0xc   :  { %261 = dma.done.wait [#allocation6], 2176  }
   0xd   :  { %262 = vsyncadd [#allocation6], 4294965120  ;;  %vm70_vm0 = vcmask 64512   ;;  %v65_v0 = vld [vmem:[#allocation5] sm:$0xff]  ;;  %v64_v1 = vld [vmem:[#allocation2] sm:$0xff]  ;;  %s270_s11 = smov [#allocation8]  }
   0xe   :  { %v110_v2 = vld [vmem:[#allocation7 + $0x78] sm:$0xff]  ;;  %89 = vmatpush.msra.mxu0 %v65_v0  ;;  %v109_v3 = vld [vmem:[#allocation7 + $0x70] sm:$0xff]  ;;  %v108_v4 = vld [vmem:[#allocation7 + $0x68] sm:$0xff]  ;;  %s141_s12 = sshll.u32 %s270_s11, 4  ;;  %s143_s15 = sshll.u32 %s324_s5, 4  ;;  %s142_s12 = int_to_ptr.vmem [resolvable:$true] %s141_s12  ;;  %s144_s15 = int_to_ptr.hbm [resolvable:$true] %s143_s15 }
   0xf   :  { %115 = vmatpush.msra.mxu1 %v110_v2  ;;  %154 = vmatmul.msk.f32.vlgmr.msra.gmra.mxu0 %vm70_vm0, %v64_v1  ;;  %v107_v5 = vld [vmem:[#allocation7 + $0x60] sm:$0xff]  ;;  %v106_v6 = vld [vmem:[#allocation7 + $0x58] sm:$0xff]  ;;  %v105_v7 = vld [vmem:[#allocation7 + $0x50] sm:$0xff] }
  0x10   :  { %v104_v8 = vld [vmem:[#allocation7 + $0x48] sm:$0xff]  ;;  %v103_v9 = vld [vmem:[#allocation7 + $0x40] sm:$0xff]  ;;  %v102_v10 = vld [vmem:[#allocation7 + $0x38] sm:$0xff] }
  0x11   :  { %116 = vmatpush.msra.mxu1 %v109_v3  ;;  %v101_v11 = vld [vmem:[#allocation7 + $0x30] sm:$0xff]  ;;  %v100_v12 = vld [vmem:[#allocation7 + $0x28] sm:$0xff]  ;;  %v99_v13 = vld [vmem:[#allocation7 + $0x20] sm:$0xff] }
  0x12   :  { %v98_v14 = vld [vmem:[#allocation7 + $0x18] sm:$0xff]  ;;  %v97_v15 = vld [vmem:[#allocation7 + $0x10] sm:$0xff]  ;;  %v96_v16 = vld [vmem:[#allocation7 + $0x8] sm:$0xff] }
  0x13   :  { %117 = vmatpush.msra.mxu1 %v108_v4  ;;  %v95_v17 = vld [vmem:[#allocation7] sm:$0xff]  ;;  %v161_v18 = vld [vmem:[%s321_s2] ss:$0 sm:$0xff] }
  0x14   :  { %v162_v22 = vld [vmem:[%s323_s4] ss:$0 sm:$0xff] }
  0x15   :  { %118 = vmatpush.msra.mxu1 %v107_v5 }
  0x17   :  { %119 = vmatpush.msra.mxu1 %v106_v6 }
  0x19   :  { %120 = vmatpush.msra.mxu1 %v105_v7 }
  0x1b   :  { %121 = vmatpush.msra.mxu1 %v104_v8 }
  0x1d   :  { %122 = vmatpush.msra.mxu1 %v103_v9 }
  0x1f   :  { %123 = vmatpush.msra.mxu1 %v102_v10 }
  0x21   :  { %124 = vmatpush.msra.mxu1 %v101_v11 }
  0x23   :  { %125 = vmatpush.msra.mxu1 %v100_v12 }
  0x25   :  { %126 = vmatpush.msra.mxu1 %v99_v13 }
  0x27   :  { %127 = vmatpush.msra.mxu1 %v98_v14 }
  0x29   :  { %128 = vmatpush.msra.mxu1 %v97_v15 }
  0x2b   :  { %129 = vmatpush.msra.mxu1 %v96_v16 }
  0x2d   :  { %130 = vmatpush.msra.mxu1 %v95_v17 }
  0x8c   :  { %v91_v19 = vpop.f32.mrf.mxu0 }
  0x8d   :  { %v92_v20 = vadd.f32 %v161_v18, %v91_v19 }
  0x8f   :  { %v94_v21 = vmax.f32 %v92_v20, 0.0 }
  0x91   :  { %131 = vmatmul.f32.vlgmr.msra.gmra.mxu1 %v94_v21 }
 0x10e   :  { %v132_v23 = vpop.f32.mrf.mxu1 }
 0x10f   :  { %v133_v24 = vadd.f32 %v162_v22, %v132_v23 }
 0x111   :  { %135 = vst [vmem:[#allocation8] sm:$0xff] %v133_v24 }
 0x112   :  { %146 = dma.vmem_to_hbm [thread:$0]  %s142_s12, 128, %s144_s15, [#allocation4]  }
 0x113   :  { %263 = dma.done.wait [#allocation4], 128  }
 0x114   :  { %264 = vsyncadd [#allocation4], 4294967168 }
 0x115   :  { %151 = vsyncpa [#allocation3], 1 }
 0x116   :  { %152 = vsyncpa [#allocation6], 1 }
 0x117   :  { %153 = vsyncpa [#allocation4], 1 }

</bundles_post_ra>
